<compile_context>
chip_gen: v6e
topology: v6e:2x2x1
jax: 0.10.0
libtpu: 0.0.40
codegen_flags: <defaults>
</compile_context>

<pallas_src>
import functools

import jax
import jax.numpy as jnp
from jax import lax
from jax.experimental import pallas as pl
from jax.experimental.pallas import tpu as pltpu

_LANE = 128
_SUBLANE = 8


def _round_up(x, m):
    return (x + m - 1) // m * m


def _wan_reduce_kernel(p_ref, t_ref, o_ref, *, gamma, epsilon,
                       block_b, block_c, valid_b, valid_c, masked):
    """Accumulate per-batch-block partial sums of the WAN loss.

    Grid: (batch blocks [parallel], class blocks [arbitrary/reduction]).
    o_ref is an (8, block_c) lane-dense partial-sum tile, resident across the
    class axis (the output BlockSpec returns the same block for every j).
    """
    j = pl.program_id(1)

    @pl.when(j == 0)
    def _():
        o_ref[...] = jnp.zeros_like(o_ref)

    p = p_ref[...].astype(jnp.float32)
    t = t_ref[...].astype(jnp.float32)

    p = jnp.clip(p, epsilon, 1.0 - epsilon)
    loss = -(t * jnp.log(p) + gamma * ((1.0 - t) * jnp.log(1.0 - p)))

    if masked:
        # Zero out padded rows/cols so the reduction matches the unpadded ref.
        i = pl.program_id(0)
        row = i * block_b + lax.broadcasted_iota(jnp.int32, (block_b, block_c), 0)
        col = j * block_c + lax.broadcasted_iota(jnp.int32, (block_b, block_c), 1)
        loss = jnp.where((row < valid_b) & (col < valid_c), loss, 0.0)

    # Fold sublane-groups onto the (8, block_c) accumulator: pure VPU vreg
    # adds; no cross-lane reduce, no scalar dependency chain in the hot loop.
    o_ref[...] += loss.reshape(block_b // _SUBLANE, _SUBLANE, block_c).sum(axis=0)


def _wan_elementwise_kernel(p_ref, t_ref, o_ref, *, gamma, epsilon):
    """reduction='none': per-element WAN loss."""
    p = jnp.clip(p_ref[...].astype(jnp.float32), epsilon, 1.0 - epsilon)
    t = t_ref[...].astype(jnp.float32)
    o_ref[...] = -(t * jnp.log(p) + gamma * ((1.0 - t) * jnp.log(1.0 - p)))


def _choose_blocks(B, C, in_itemsize, block_batch, block_classes,
                   target_tile_bytes, max_block_classes):
    """Pick lane-dense, VMEM-sized tiles (~target_tile_bytes per input tile)."""
    if block_classes is None:
        block_classes = min(_round_up(C, _LANE), max_block_classes)
    block_classes = _round_up(block_classes, _LANE)
    if block_batch is None:
        rows = max(target_tile_bytes // (block_classes * in_itemsize), _SUBLANE)
        block_batch = min(_round_up(B, _SUBLANE), rows)
    block_batch = _round_up(block_batch, _SUBLANE)
    return block_batch, block_classes


def wan_loss(probabilities, targets, *, gamma=1.0, epsilon=1e-7,
             reduction="mean", block_batch=None, block_classes=None,
             target_tile_bytes=4 << 20, max_block_classes=2048,
             vmem_limit_bytes=32 << 20):
    """Weak Assume Negative loss. probabilities/targets: (batch, num_classes)."""
    assert probabilities.shape == targets.shape
    assert probabilities.ndim == 2
    if reduction not in ("mean", "sum", "none"):
        raise ValueError(f"unknown reduction: {reduction!r}")

    B, C = probabilities.shape
    in_itemsize = max(probabilities.dtype.itemsize, targets.dtype.itemsize)
    bb, bc = _choose_blocks(B, C, in_itemsize, block_batch, block_classes,
                            target_tile_bytes, max_block_classes)

    Bp, Cp = _round_up(B, bb), _round_up(C, bc)
    needs_pad = (Bp != B) or (Cp != C)
    p, t = probabilities, targets
    if needs_pad:
        # Benign pad values (finite loss); padded elements are masked out in
        # the reduction kernels or sliced off for reduction='none'.
        p = jnp.pad(p, ((0, Bp - B), (0, Cp - C)), constant_values=0.5)
        t = jnp.pad(t, ((0, Bp - B), (0, Cp - C)), constant_values=0.0)

    nb, nc = Bp // bb, Cp // bc
    in_specs = [
        pl.BlockSpec((bb, bc), lambda i, j: (i, j)),
        pl.BlockSpec((bb, bc), lambda i, j: (i, j)),
    ]
    out_bytes = Bp * Cp * 4 if reduction == "none" else nb * _SUBLANE * bc * 4
    cost = pl.CostEstimate(
        flops=6 * Bp * Cp,
        transcendentals=2 * Bp * Cp,
        bytes_accessed=p.size * p.dtype.itemsize
                       + t.size * t.dtype.itemsize + out_bytes,
    )

    if reduction == "none":
        kernel = functools.partial(_wan_elementwise_kernel,
                                   gamma=float(gamma), epsilon=float(epsilon))
        out = pl.pallas_call(
            kernel,
            out_shape=jax.ShapeDtypeStruct((Bp, Cp), jnp.float32),
            grid_spec=pl.GridSpec(
                grid=(nb, nc),
                in_specs=in_specs,
                out_specs=pl.BlockSpec((bb, bc), lambda i, j: (i, j)),
            ),
            compiler_params=pltpu.CompilerParams(
                dimension_semantics=("parallel", "parallel"),
                vmem_limit_bytes=vmem_limit_bytes),
            cost_estimate=cost,
        )(p, t)
        return out[:B, :C] if needs_pad else out

    kernel = functools.partial(
        _wan_reduce_kernel, gamma=float(gamma), epsilon=float(epsilon),
        block_b=bb, block_c=bc, valid_b=B, valid_c=C, masked=needs_pad)
    partials = pl.pallas_call(
        kernel,
        # Lane-dense per-batch-block partial sums: (nb * 8, block_classes).
        out_shape=jax.ShapeDtypeStruct((nb * _SUBLANE, bc), jnp.float32),
        grid_spec=pl.GridSpec(
            grid=(nb, nc),
            in_specs=in_specs,
            out_specs=pl.BlockSpec((_SUBLANE, bc), lambda i, j: (i, 0)),
        ),
        compiler_params=pltpu.CompilerParams(
            dimension_semantics=("parallel", "arbitrary"),
            vmem_limit_bytes=vmem_limit_bytes),
        cost_estimate=cost,
    )(p, t)

    total = jnp.sum(partials)  # single tiny cross-lane reduce, done once
    if reduction == "mean":
        total = total / jnp.float32(B * C)
    return total


def wan_loss_ref(probabilities, targets, gamma=1.0, epsilon=1e-7,
                 reduction="mean"):
    p = jnp.clip(probabilities.astype(jnp.float32), epsilon, 1.0 - epsilon)
    t = targets.astype(jnp.float32)
    loss = -(t * jnp.log(p) + gamma * ((1.0 - t) * jnp.log(1.0 - p)))
    if reduction == "mean":
        return loss.mean()
    if reduction == "sum":
        return loss.sum()
    return loss


if __name__ == "__main__":
    key = jax.random.PRNGKey(0)
    k1, k2 = jax.random.split(key)

    # Small shapes: (batch=16, num_classes=200).  200 is deliberately not a
    # multiple of 128 so the pad + in-kernel mask path is exercised.
    B, C = 16, 200
    # probabilities: post-sigmoid predictions in (0, 1)
    probabilities = jax.nn.sigmoid(jax.random.normal(k1, (B, C), jnp.float32))
    # targets: multi-label {0, 1}
    targets = (jax.random.uniform(k2, (B, C)) > 0.8).astype(jnp.float32)

    gamma, eps = 2.0, 1e-7

    # mean, auto-sized tiles (single-block grid at this size)
    out_mean = jax.block_until_ready(
        wan_loss(probabilities, targets, gamma=gamma, epsilon=eps,
                 reduction="mean"))
    ref_mean = wan_loss_ref(probabilities, targets, gamma, eps, "mean")
    assert jnp.allclose(out_mean, ref_mean, rtol=1e-4, atol=1e-5), (out_mean, ref_mean)

    # sum, small explicit blocks -> multi-block 2D grid with accumulation
    # across the class (reduction) axis and multiple batch blocks.
    out_sum = jax.block_until_ready(
        wan_loss(probabilities, targets, gamma=gamma, epsilon=eps,
                 reduction="sum", block_batch=8, block_classes=128))
    ref_sum = wan_loss_ref(probabilities, targets, gamma, eps, "sum")
    assert jnp.allclose(out_sum, ref_sum, rtol=1e-4, atol=1e-4), (out_sum, ref_sum)

    # none (per-element loss)
    out_none = jax.block_until_ready(
        wan_loss(probabilities, targets, gamma=gamma, epsilon=eps,
                 reduction="none", block_batch=8, block_classes=128))
    ref_none = wan_loss_ref(probabilities, targets, gamma, eps, "none")
    assert out_none.shape == (B, C)
    assert jnp.allclose(out_none, ref_none, rtol=1e-5, atol=1e-6)

    print("KERNEL_OK")
</pallas_src>

<mosaic_0001>
module attributes {stable_mosaic.version = 11 : i64} {
  func.func @_wan_reduce_kernel(%arg0: i32, %arg1: i32, %arg2: memref<16x256xf32, #tpu.memory_space<vmem>>, %arg3: memref<16x256xf32, #tpu.memory_space<vmem>>, %arg4: memref<8x256xf32, #tpu.memory_space<vmem>>) attributes {dimension_semantics = [#tpu.dimension_semantics<parallel>, #tpu.dimension_semantics<arbitrary>], iteration_bounds = array<i64: 1, 1>, scalar_prefetch = 0 : i64, scratch_operands = 0 : i64, tpu.core_type = #tpu.core_type<tc>, window_params = [{transform_indices = @transform_0, window_bounds = array<i64: 16, 256>}, {transform_indices = @transform_1, window_bounds = array<i64: 16, 256>}, {transform_indices = @transform_2, window_bounds = array<i64: 8, 256>}]} {
    %c0_i32 = arith.constant 0 : i32
    %0 = arith.cmpi eq, %arg1, %c0_i32 : i32
    %1 = arith.extui %0 : i1 to i32
    %c0_i32_0 = arith.constant 0 : i32
    %2 = arith.cmpi ne, %1, %c0_i32_0 : i32
    scf.if %2 {
      %cst_16 = arith.constant 0.000000e+00 : f32
      %42 = vector.broadcast %cst_16 : f32 to vector<8x256xf32>
      %c0_17 = arith.constant 0 : index
      %c0_18 = arith.constant 0 : index
      %43 = vector.load %arg4[%c0_17, %c0_18] : memref<8x256xf32, #tpu.memory_space<vmem>>, vector<8x256xf32>
      tpu.vector_store %arg4[%c0_17, %c0_18], %42 {strides = array<i32>} : memref<8x256xf32, #tpu.memory_space<vmem>>, vector<8x256xf32>,
    } else {
    }
    %c0 = arith.constant 0 : index
    %c0_1 = arith.constant 0 : index
    %3 = vector.load %arg2[%c0, %c0_1] : memref<16x256xf32, #tpu.memory_space<vmem>>, vector<16x256xf32>
    %c0_2 = arith.constant 0 : index
    %c0_3 = arith.constant 0 : index
    %4 = vector.load %arg3[%c0_2, %c0_3] : memref<16x256xf32, #tpu.memory_space<vmem>>, vector<16x256xf32>
    %cst = arith.constant 1.000000e-07 : f32
    %cst_4 = arith.constant 0.99999988 : f32
    %5 = vector.broadcast %cst : f32 to vector<16x256xf32>
    %6 = arith.maximumf %5, %3 : vector<16x256xf32>
    %7 = vector.broadcast %cst_4 : f32 to vector<16x256xf32>
    %8 = arith.minimumf %7, %6 : vector<16x256xf32>
    %9 = math.log %8 : vector<16x256xf32>
    %10 = arith.mulf %4, %9 : vector<16x256xf32>
    %cst_5 = arith.constant 1.000000e+00 : f32
    %11 = vector.broadcast %cst_5 : f32 to vector<16x256xf32>
    %12 = arith.subf %11, %4 : vector<16x256xf32>
    %cst_6 = arith.constant 1.000000e+00 : f32
    %13 = vector.broadcast %cst_6 : f32 to vector<16x256xf32>
    %14 = arith.subf %13, %8 : vector<16x256xf32>
    %15 = math.log %14 : vector<16x256xf32>
    %16 = arith.mulf %12, %15 : vector<16x256xf32>
    %cst_7 = arith.constant 2.000000e+00 : f32
    %17 = vector.broadcast %cst_7 : f32 to vector<16x256xf32>
    %18 = arith.mulf %17, %16 : vector<16x256xf32>
    %19 = arith.addf %10, %18 : vector<16x256xf32>
    %cst_8 = arith.constant 0.000000e+00 : f32
    %20 = vector.broadcast %cst_8 : f32 to vector<16x256xf32>
    %21 = arith.subf %20, %19 : vector<16x256xf32>
    %c16_i32 = arith.constant 16 : i32
    %22 = arith.muli %arg0, %c16_i32 : i32
    %23 = tpu.iota {dimensions = array<i32: 0>} : vector<16x256xi32>
    %24 = vector.broadcast %22 : i32 to vector<16x256xi32>
    %25 = arith.addi %24, %23 : vector<16x256xi32>
    %c256_i32 = arith.constant 256 : i32
    %26 = arith.muli %arg1, %c256_i32 : i32
    %27 = tpu.iota {dimensions = array<i32: 1>} : vector<16x256xi32>
    %28 = vector.broadcast %26 : i32 to vector<16x256xi32>
    %29 = arith.addi %28, %27 : vector<16x256xi32>
    %c16_i32_9 = arith.constant 16 : i32
    %30 = vector.broadcast %c16_i32_9 : i32 to vector<16x256xi32>
    %31 = arith.cmpi slt, %25, %30 : vector<16x256xi32>
    %c200_i32 = arith.constant 200 : i32
    %32 = vector.broadcast %c200_i32 : i32 to vector<16x256xi32>
    %33 = arith.cmpi slt, %29, %32 : vector<16x256xi32>
    %34 = arith.andi %31, %33 : vector<16x256xi1>
    %cst_10 = arith.constant 0.000000e+00 : f32
    %35 = vector.broadcast %cst_10 : f32 to vector<16x256xf32>
    %36 = arith.select %34, %21, %35 : vector<16x256xi1>, vector<16x256xf32>
    %c0_11 = arith.constant 0 : index
    %c0_12 = arith.constant 0 : index
    %37 = vector.load %arg4[%c0_11, %c0_12] : memref<8x256xf32, #tpu.memory_space<vmem>>, vector<8x256xf32>
    %38 = vector.shape_cast %36 : vector<16x256xf32> to vector<2x8x256xf32>
    %cst_13 = arith.constant dense<0.000000e+00> : vector<8x256xf32>
    %39 = vector.multi_reduction <add>, %38, %cst_13 [0] : vector<2x8x256xf32> to vector<8x256xf32>
    %40 = arith.addf %37, %39 : vector<8x256xf32>
    %c0_14 = arith.constant 0 : index
    %c0_15 = arith.constant 0 : index
    %41 = vector.load %arg4[%c0_14, %c0_15] : memref<8x256xf32, #tpu.memory_space<vmem>>, vector<8x256xf32>
    tpu.vector_store %arg4[%c0_14, %c0_15], %40 {strides = array<i32>} : memref<8x256xf32, #tpu.memory_space<vmem>>, vector<8x256xf32>,
    return
  }
  func.func @transform_0(%arg0: i32, %arg1: i32) -> (i32, i32) {
    %c0_i32 = arith.constant 0 : i32
    return %arg0, %arg1 : i32, i32
  }
  func.func @transform_1(%arg0: i32, %arg1: i32) -> (i32, i32) {
    %c0_i32 = arith.constant 0 : i32
    return %arg0, %arg1 : i32, i32
  }
  func.func @transform_2(%arg0: i32, %arg1: i32) -> (i32, i32) {
    %c0_i32 = arith.constant 0 : i32
    %c0_i32_0 = arith.constant 0 : i32
    return %arg0, %c0_i32 : i32, i32
  }
}

</mosaic_0001>

<bundles_post_ra>
// kernel: tpu_custom_call.1
= control target key start
LH: loop header
LB: loop body
LE: loop exit
PB: predicated region body
PF: predicated region fallthrough
CT: control target
= control target key end

     0   :  { %7 = vsyncpa [#allocation3], 0  ;;  %s273_s0 = inlined_call_operand.hbm [shape: f32[16,256], index: 0, kind: input, shape index: {}]   ;;  %s274_s1 = inlined_call_operand.hbm [shape: f32[16,256], index: 1, kind: input, shape index: {}]   ;;  %s275_s2 = inlined_call_operand.hbm [shape: f32[8,256], index: 2, kind: output, shape index: {}]  }
   0x1   :  { %8 = vsyncpa [#allocation6], 0 }
   0x2   :  { %9 = vsyncpa [#allocation4], 0  ;;  %s244_s9 = smov [#allocation2]  }
   0x3   :  { %s15_s10 = sshll.u32 %s244_s9, 4  ;;  %s16_s10 = int_to_ptr.vmem [resolvable:$true] %s15_s10 }
   0x4   :  { %s186_s11 = scalar_lea.vmem %s16_s10, 512  ;;  %p191_p1 = scmp.lt.s32.totalorder %s16_s10, %s16_s10 }
   0x5   :  { %p187_p0 = scmp.ne.s32.totalorder %s16_s10, %s186_s11  ;;  %p192_p2 = scmp.lt.s32.totalorder %s186_s11, %s186_s11 }
   0x7   :  { %p193_p3 = por %p192_p2, %p191_p1 }
   0x9   :  { %p194_p4 = pnand %p193_p3, %p187_p0 }
   0xb   :  { %197 = shalt.err (!%p194_p4)
}
   0xc   :  { %s245_s12 = smov 256   ;;  %s246_s13 = smov 16  }
   0xd   :  { %21 = dma.hbm_to_vmem [thread:$0]  %s273_s0, 512, %s16_s10, [#allocation3], %s245_s12, %s245_s12, %s246_s13  }
   0xe   :  { %s247_s16 = smov [#allocation5]  }
   0xf   :  { %s27_s17 = sshll.u32 %s247_s16, 4  ;;  %s28_s17 = int_to_ptr.vmem [resolvable:$true] %s27_s17 }
  0x10   :  { %s206_s18 = scalar_lea.vmem %s28_s17, 512  ;;  %p211_p6 = scmp.lt.s32.totalorder %s28_s17, %s28_s17 }
  0x11   :  { %p207_p5 = scmp.ne.s32.totalorder %s28_s17, %s206_s18  ;;  %p212_p7 = scmp.lt.s32.totalorder %s206_s18, %s206_s18 }
  0x13   :  { %p213_p8 = por %p212_p7, %p211_p6 }
  0x15   :  { %p214_p9 = pnand %p213_p8, %p207_p5 }
  0x17   :  { %217 = shalt.err (!%p214_p9)
}
  0x18   :  { %33 = dma.hbm_to_vmem [thread:$0]  %s274_s1, 512, %s28_s17, [#allocation6], %s245_s12, %s245_s12, %s246_s13  }
  0x19   :  { %238 = dma.done.wait [#allocation3], 512  }
  0x1a   :  { %239 = vsyncadd [#allocation3], 4294966784 }
  0x1b   :  { %240 = dma.done.wait [#allocation6], 512  }
  0x1c   :  { %241 = vsyncadd [#allocation6], 4294966784  ;;  %v46_v0 = vld [vmem:[#allocation2] sm:$0xff]  ;;  %v48_v1 = vld [vmem:[#allocation2 + $0x10] sm:$0xff]  ;;  %v114_v19 = vlaneseq  ;;  %s248_s0 = smov [#allocation7]  }
  0x1d   :  { %v54_v2 = vmax.f32 %v46_v0, 1e-07  ;;  %v56_v3 = vmax.f32 %v48_v1, 1e-07  ;;  %v47_v4 = vld [vmem:[#allocation2 + $0x8] sm:$0xff]  ;;  %v49_v5 = vld [vmem:[#allocation2 + $0x18] sm:$0xff] }
  0x1e   :  { %v55_v8 = vmax.f32 %v47_v4, 1e-07  ;;  %v57_v9 = vmax.f32 %v49_v5, 1e-07  ;;  %v50_v16 = vld [vmem:[#allocation5] sm:$0xff]  ;;  %v52_v17 = vld [vmem:[#allocation5 + $0x10] sm:$0xff] }
  0x1f   :  { %v58_v6 = vmin.f32 %v54_v2, 0.9999999  ;;  %v60_v7 = vmin.f32 %v56_v3, 0.9999999  ;;  %v74_v22 = vsub.f32 1.0, %v50_v16  ;;  %v76_v25 = vsub.f32 1.0, %v52_v17 }
  0x20   :  { %v59_v12 = vmin.f32 %v55_v8, 0.9999999  ;;  %v61_v13 = vmin.f32 %v57_v9, 0.9999999  ;;  %v51_v26 = vld [vmem:[#allocation5 + $0x8] sm:$0xff]  ;;  %v53_v29 = vld [vmem:[#allocation5 + $0x18] sm:$0xff] }
  0x21   :  { %162 = vlog2.f32 %v58_v6  ;;  %v78_v10 = vsub.f32 1.0, %v58_v6  ;;  %v80_v11 = vsub.f32 1.0, %v60_v7  ;;  %v115_v32 = vand.u32 127, %v114_v19  ;;  %s146_s1 = sshll.u32 %s248_s0, 4  ;;  %s147_s1 = int_to_ptr.vmem [resolvable:$true] %s146_s1 }
  0x22   :  { %164 = vlog2.f32 %v60_v7  ;;  %v79_v14 = vsub.f32 1.0, %v59_v12  ;;  %v81_v15 = vsub.f32 1.0, %v61_v13  ;;  %v75_v37 = vsub.f32 1.0, %v51_v26  ;;  %s218_s21 = scalar_lea.vmem %s147_s1, 256  ;;  %p223_p11 = scmp.lt.s32.totalorder %s147_s1, %s147_s1 }
  0x23   :  { %166 = vlog2.f32 %v78_v10  ;;  %v77_v42 = vsub.f32 1.0, %v53_v29  ;;  %v116_v54 = vadd.s32 128, %v115_v32  ;;  %p219_p10 = scmp.ne.s32.totalorder %s147_s1, %s218_s21  ;;  %p224_p12 = scmp.lt.s32.totalorder %s218_s21, %s218_s21 }
  0x24   :  { %168 = vlog2.f32 %v80_v11 }
  0x25   :  { %170 = vlog2.f32 %v59_v12  ;;  %vm123_vm0 = vcmp.lt.s32.totalorder %v116_v54, 200  ;;  %p225_p13 = por %p224_p12, %p223_p11 }
  0x26   :  { %172 = vlog2.f32 %v61_v13 }
  0x27   :  { %174 = vlog2.f32 %v79_v14  ;;  %p226_p0 = pnand %p225_p13, %p219_p10 }
  0x28   :  { %176 = vlog2.f32 %v81_v15 }
  0x2e   :  { %v163_v18 = vpop.eup %162 }
  0x2f   :  { %v165_v20 = vpop.eup %164  ;;  %v63_v21 = vmul.f32 0.6931472, %v163_v18 }
  0x30   :  { %v167_v23 = vpop.eup %166  ;;  %v67_v24 = vmul.f32 0.6931472, %v165_v20 }
  0x31   :  { %v169_v27 = vpop.eup %168  ;;  %v83_v28 = vmul.f32 0.6931472, %v167_v23  ;;  %v70_v34 = vmul.f32 %v63_v21, %v50_v16 }
  0x32   :  { %v171_v30 = vpop.eup %170  ;;  %v87_v31 = vmul.f32 0.6931472, %v169_v27  ;;  %v72_v39 = vmul.f32 %v67_v24, %v52_v17 }
  0x33   :  { %v173_v33 = vpop.eup %172  ;;  %v90_v35 = vmul.f32 %v83_v28, %v74_v22  ;;  %v65_v36 = vmul.f32 0.6931472, %v171_v30 }
  0x34   :  { %v175_v38 = vpop.eup %174  ;;  %v92_v40 = vmul.f32 %v87_v31, %v76_v25  ;;  %v69_v41 = vmul.f32 0.6931472, %v173_v33 }
  0x35   :  { %v177_v43 = vpop.eup %176  ;;  %v94_v44 = vmul.f32 2.0, %v90_v35  ;;  %v85_v45 = vmul.f32 0.6931472, %v175_v38  ;;  %v71_v49 = vmul.f32 %v65_v36, %v51_v26 }
  0x36   :  { %v96_v46 = vmul.f32 2.0, %v92_v40  ;;  %v89_v47 = vmul.f32 0.6931472, %v177_v43  ;;  %v73_v52 = vmul.f32 %v69_v41, %v53_v29 }
  0x37   :  { %v98_v48 = vadd.f32 %v94_v44, %v70_v34  ;;  %v91_v50 = vmul.f32 %v85_v45, %v75_v37 }
  0x38   :  { %v100_v51 = vadd.f32 %v96_v46, %v72_v39  ;;  %v93_v53 = vmul.f32 %v89_v47, %v77_v42 }
  0x39   :  { %v102_v55 = vsub.f32 0.0, %v98_v48  ;;  %v95_v56 = vmul.f32 2.0, %v91_v50 }
  0x3a   :  { %v104_v57 = vsub.f32 0.0, %v100_v51  ;;  %v97_v58 = vmul.f32 2.0, %v93_v53 }
  0x3b   :  { %v99_v59 = vadd.f32 %v95_v56, %v71_v49 }
  0x3c   :  { %v134_v60 = vadd.f32 %v104_v57, %v102_v55  ;;  %v101_v61 = vadd.f32 %v97_v58, %v73_v52 }
  0x3d   :  { %v103_v62 = vsub.f32 0.0, %v99_v59 }
  0x3e   :  { %v105_v63 = vsub.f32 0.0, %v101_v61  ;;  %138 = vst [vmem:[#allocation7] sm:$0xff] %v134_v60 }
  0x3f   :  { %v129_v0 = vsel %vm123_vm0, %v103_v62, 0.0 }
  0x40   :  { %v131_v1 = vsel %vm123_vm0, %v105_v63, 0.0 }
  0x41   :  { %v135_v2 = vadd.f32 %v131_v1, %v129_v0 }
  0x43   :  { %139 = vst [vmem:[#allocation7 + $0x8] sm:$0xff] %v135_v2 }
  0x44   :  { %229 = shalt.err (!%p226_p0)
}
  0x45   :  { %149 = dma.vmem_to_hbm [thread:$0]  %s147_s1, 256, %s275_s2, [#allocation4]  }
  0x46   :  { %242 = dma.done.wait [#allocation4], 256  }
  0x47   :  { %243 = vsyncadd [#allocation4], 4294967040 }
  0x48   :  { %153 = vsyncpa [#allocation3], 1 }
  0x49   :  { %154 = vsyncpa [#allocation6], 1 }
  0x4a   :  { %155 = vsyncpa [#allocation4], 1 }

</bundles_post_ra>
